<compile_context>
chip_gen: v7x
topology: tpu7x:2x2x1
jax: 0.10.0
libtpu: 0.0.40
codegen_flags: <defaults>
</compile_context>

<pallas_src>
import functools

import jax
import jax.numpy as jnp
from jax.experimental import pallas as pl
from jax.experimental.pallas import tpu as pltpu


def _round_up(x: int, m: int) -> int:
    return ((x + m - 1) // m) * m


def patch_embed_kernel(patches_ref, w_ref, b_ref, out_ref):
    # patches_ref: (TM, K) bf16, w_ref: (K, Ep) bf16 (VMEM-resident, constant
    # index map), b_ref: (1, Ep) f32, out_ref: (TM, Ep).
    # MXU matmul with f32 accumulation; bias add stays in f32 (one VPU add per
    # tile, hidden under MXU work).
    acc = jnp.dot(patches_ref[...], w_ref[...],
                  preferred_element_type=jnp.float32)
    out_ref[...] = (acc + b_ref[...]).astype(out_ref.dtype)


@functools.partial(jax.jit, static_argnames=("patch_size", "out_dtype"))
def patch_embed(x, weight, bias, *, patch_size, out_dtype=None):
    """x: (B, C, H, W); weight: (E, C, P, P); bias: (E,). Returns (B, N, E).

    NOTE: operands are fed to the MXU in bf16 with f32 accumulation, so results
    differ from a true f32 Conv2d at bf16-level error.
    """
    B, C, H, W = x.shape
    E = weight.shape[0]
    P = patch_size
    Hp, Wp = H // P, W // P
    N = Hp * Wp
    K = C * P * P
    M = B * N
    out_dtype = x.dtype if out_dtype is None else out_dtype
    out_bytes = jnp.dtype(out_dtype).itemsize

    # --- glue: im2col patch extraction. Cast to bf16 FIRST so any materialized
    # copy of the layout-changing transpose writes 2-byte data; flatten order
    # (C, Ph, Pw) matches the PyTorch Conv2d weight layout. Marked fusable into
    # the pallas operand.
    xb = x.astype(jnp.bfloat16)
    xp = jnp.transpose(xb.reshape(B, C, Hp, P, Wp, P), (0, 2, 4, 1, 3, 5))
    patches = xp.reshape(M, K)

    # conv weight (E, C, P, P) -> (K, E) matmul weight; bf16 feeds the MXU.
    w_mat = weight.reshape(E, K).T.astype(jnp.bfloat16)
    b_mat = bias.reshape(1, E).astype(jnp.float32)

    # --- tiling: E axis collapsed (single tile = full padded E, lane-dense and
    # weight-resident). M tiled with TM <= 1024, chosen against a VMEM budget.
    Ep = _round_up(E, 128)

    def vmem_need(tm):
        # double-buffered patches + output tiles, plus the resident (but still
        # double-buffer-allocated) weight and bias.
        return (2 * (tm * K * 2 + tm * Ep * out_bytes)
                + 2 * (K * Ep * 2 + Ep * 4))

    TM = min(1024, _round_up(M, 8))
    while TM > 128 and vmem_need(TM) > (24 << 20):
        TM = _round_up(TM // 2, 8)
    Mp = _round_up(M, TM)

    if Mp != M:
        patches = jnp.pad(patches, ((0, Mp - M), (0, 0)))
    if Ep != E:
        w_mat = jnp.pad(w_mat, ((0, 0), (0, Ep - E)))
        b_mat = jnp.pad(b_mat, ((0, 0), (0, Ep - E)))

    grid = (Mp // TM,)

    # Raise the scoped-VMEM limit above v5e's 16 MiB default; stay well under
    # v7x's 64 MiB physical per-TC VMEM.
    vmem_limit = int(min(max(2 * vmem_need(TM), 32 << 20), 48 << 20))

    cost = pl.CostEstimate(
        flops=2 * Mp * K * Ep,
        transcendentals=0,
        bytes_accessed=(Mp * K * 2          # patches, read once (bf16)
                        + K * Ep * 2        # weight, read once (bf16)
                        + Ep * 4            # bias (f32)
                        + Mp * Ep * out_bytes),  # output
    )

    out = pl.pallas_call(
        patch_embed_kernel,
        out_shape=jax.ShapeDtypeStruct((Mp, Ep), out_dtype),
        grid_spec=pltpu.PrefetchScalarGridSpec(
            num_scalar_prefetch=0,
            grid=grid,
            in_specs=[
                # patches tile varies with i only.
                pl.BlockSpec((TM, K), lambda i: (i, 0)),
                # weight: constant index map -> single DMA, VMEM-resident.
                pl.BlockSpec((K, Ep), lambda i: (0, 0)),
                # bias: constant index map -> single DMA.
                pl.BlockSpec((1, Ep), lambda i: (0, 0)),
            ],
            out_specs=pl.BlockSpec((TM, Ep), lambda i: (i, 0)),
        ),
        compiler_params=pltpu.CompilerParams(
            # Independent output tiles along M: let v7x megacore split them.
            dimension_semantics=("parallel",),
            vmem_limit_bytes=vmem_limit,
            # Allow XLA to fuse the bf16 cast / im2col transpose / pad into the
            # operand feed instead of materializing a second HBM copy.
            allow_input_fusion=[True, True, True],
        ),
        cost_estimate=cost,
    )(patches, w_mat, b_mat)

    out = out[:M, :E]
    return out.reshape(B, N, E)


if __name__ == "__main__":
    # Small shapes consistent with the module: img_size=16, patch_size=4,
    # in_chans=4, embed_dim=32  ->  num_patches = (16 // 4) ** 2 = 16.
    B, C, IMG, P, EMBED = 2, 4, 16, 4, 32

    key = jax.random.PRNGKey(0)
    kx, kw, kb = jax.random.split(key, 3)

    x = jax.random.normal(kx, (B, C, IMG, IMG), dtype=jnp.float32)
    # deterministic "conv" params (shapes from nn.Conv2d(C, EMBED, P, stride=P))
    weight = jax.random.normal(kw, (EMBED, C, P, P), dtype=jnp.float32) * 0.02
    bias = jax.random.normal(kb, (EMBED,), dtype=jnp.float32) * 0.02

    out = patch_embed(x, weight, bias, patch_size=P)
    out = jax.block_until_ready(out)

    # sanity check against a pure-JAX f32 reference
    Hp = Wp = IMG // P
    ref_patches = jnp.transpose(
        x.reshape(B, C, Hp, P, Wp, P), (0, 2, 4, 1, 3, 5)
    ).reshape(B * Hp * Wp, C * P * P)
    ref = (ref_patches @ weight.reshape(EMBED, -1).T + bias).reshape(
        B, Hp * Wp, EMBED)

    assert out.shape == (B, Hp * Wp, EMBED)
    # bf16 MXU inputs with f32 accumulation: allow bf16-level tolerance.
    assert jnp.allclose(out, ref, atol=2e-2, rtol=2e-2), float(
        jnp.max(jnp.abs(out - ref)))

    print("KERNEL_OK")
</pallas_src>

<mosaic_0001>
module attributes {stable_mosaic.version = 11 : i64} {
  func.func @patch_embed_kernel(%arg0: i32, %arg1: memref<32x64xbf16, #tpu.memory_space<vmem>>, %arg2: memref<64x128xbf16, #tpu.memory_space<vmem>>, %arg3: memref<1x128xf32, #tpu.memory_space<vmem>>, %arg4: memref<32x128xf32, #tpu.memory_space<vmem>>) attributes {dimension_semantics = [#tpu.dimension_semantics<parallel>], iteration_bounds = array<i64: 1>, scalar_prefetch = 0 : i64, scratch_operands = 0 : i64, tpu.core_type = #tpu.core_type<tc>, window_params = [{transform_indices = @transform_0, window_bounds = array<i64: 32, 64>}, {pipeline_mode = #tpu.pipeline_mode<synchronous>, transform_indices = @transform_1, window_bounds = array<i64: 64, 128>}, {pipeline_mode = #tpu.pipeline_mode<synchronous>, transform_indices = @transform_2, window_bounds = array<i64: 1, 128>}, {transform_indices = @transform_3, window_bounds = array<i64: 32, 128>}]} {
    %c0 = arith.constant 0 : index
    %c0_0 = arith.constant 0 : index
    %0 = vector.load %arg1[%c0, %c0_0] : memref<32x64xbf16, #tpu.memory_space<vmem>>, vector<32x64xbf16>
    %c0_1 = arith.constant 0 : index
    %c0_2 = arith.constant 0 : index
    %1 = vector.load %arg2[%c0_1, %c0_2] : memref<64x128xbf16, #tpu.memory_space<vmem>>, vector<64x128xbf16>
    %cst = arith.constant dense<0.000000e+00> : vector<32x128xf32>
    %2 = tpu.matmul %0, %1, %cst {dimension_numbers = #tpu.dot_dimension_numbers<[1], [0], [0], [1], [0, 0, 1, 1], [], []>} : vector<32x64xbf16>, vector<64x128xbf16>, vector<32x128xf32> -> vector<32x128xf32>
    %c0_3 = arith.constant 0 : index
    %c0_4 = arith.constant 0 : index
    %3 = vector.load %arg3[%c0_3, %c0_4] : memref<1x128xf32, #tpu.memory_space<vmem>>, vector<1x128xf32>
    %4 = vector.broadcast %3 : vector<1x128xf32> to vector<32x128xf32>
    %5 = arith.addf %2, %4 : vector<32x128xf32>
    %c0_5 = arith.constant 0 : index
    %c0_6 = arith.constant 0 : index
    %6 = vector.load %arg4[%c0_5, %c0_6] : memref<32x128xf32, #tpu.memory_space<vmem>>, vector<32x128xf32>
    tpu.vector_store %arg4[%c0_5, %c0_6], %5 {strides = array<i32>} : memref<32x128xf32, #tpu.memory_space<vmem>>, vector<32x128xf32>,
    return
  }
  func.func @transform_0(%arg0: i32) -> (i32, i32) {
    %c0_i32 = arith.constant 0 : i32
    %c0_i32_0 = arith.constant 0 : i32
    return %arg0, %c0_i32 : i32, i32
  }
  func.func @transform_1(%arg0: i32) -> (i32, i32) {
    %c0_i32 = arith.constant 0 : i32
    %c0_i32_0 = arith.constant 0 : i32
    %c0_i32_1 = arith.constant 0 : i32
    return %c0_i32, %c0_i32_0 : i32, i32
  }
  func.func @transform_2(%arg0: i32) -> (i32, i32) {
    %c0_i32 = arith.constant 0 : i32
    %c0_i32_0 = arith.constant 0 : i32
    %c0_i32_1 = arith.constant 0 : i32
    return %c0_i32, %c0_i32_0 : i32, i32
  }
  func.func @transform_3(%arg0: i32) -> (i32, i32) {
    %c0_i32 = arith.constant 0 : i32
    %c0_i32_0 = arith.constant 0 : i32
    return %arg0, %c0_i32 : i32, i32
  }
}

</mosaic_0001>

<bundles_post_ra>
// kernel: patch_embed.2
= control target key start
LH: loop header
LB: loop body
LE: loop exit
PB: predicated region body
PF: predicated region fallthrough
CT: control target
= control target key end

     0   :  { %s492_s0 = inlined_call_operand.vmem [shape: bf16[32,64], index: 0, kind: input, shape index: {}]   ;;  %s493_s1 = inlined_call_operand.vmem [shape: bf16[64,32], index: 1, kind: input, shape index: {}]   ;;  %s494_s2 = inlined_call_operand.<no memory space> [shape: bf16[], index: 2, kind: input, shape index: {}]   ;;  %s495_s3 = inlined_call_operand.vmem [shape: f32[1,32], index: 3, kind: input, shape index: {}]   ;;  %s496_s4 = inlined_call_operand.<no memory space> [shape: f32[], index: 4, kind: input, shape index: {}]   ;;  %s497_s5 = inlined_call_operand.hbm [shape: f32[32,128], index: 5, kind: output, shape index: {}]  }
   0x1   :  { %v10_v0 = vstv %s494_s2  ;;  %v15_v1 = vstv %s496_s4 }
   0x2   :  { %v11_v2 = vunpack.i.l.bf16 %v10_v0 }
   0x3   :  { %v32_v3 = vld [vmem:[%s493_s1] sm:$0xff]   ;;  %v35_v4 = vlaneseq  ;;  %v341_v5 = vld [vmem:[%s493_s1 + $0x8] sm:$0xff]   ;;  %v343_v6 = vld [vmem:[%s493_s1 + $0x10] sm:$0xff]   ;;  %vm264_vm0 = vcmask 523264  }
   0x4   :  { %v33_v7 = vunpack.c.l.bf16 %v32_v3  ;;  %v54_v8 = vunpack.c.h.bf16 %v32_v3  ;;  %v76_v9 = vunpack.c.l.bf16 %v341_v5  ;;  %v98_v10 = vunpack.c.h.bf16 %v341_v5  ;;  %v345_v11 = vld [vmem:[%s493_s1 + $0x18] sm:$0xff]   ;;  %v382_v13 = vld [vmem:[%s492_s0] sm:$0xff]  }
   0x5   :  { %v36_v12 = vand.u32 127, %v35_v4  ;;  %v120_v14 = vunpack.c.l.bf16 %v343_v6  ;;  %v142_v15 = vunpack.c.h.bf16 %v343_v6  ;;  %v164_v16 = vunpack.c.l.bf16 %v345_v11 }
   0x6   :  { %v186_v17 = vunpack.c.h.bf16 %v345_v11 }
   0x7   :  { %16 = vsyncpa [#allocation13], 0  ;;  %vm38_vm1 = vcmp.lt.s32.totalorder %v36_v12, 32  ;;  %370 = vmatprep.mubr.msk.bf16.mxu0 %vm264_vm0, %v382_v13  ;;  %v199_v18 = vshrl.u32 %v35_v4, 7  ;;  %v408_v23 = vmov 0.0   ;;  %v383_v43 = vld [vmem:[%s492_s0 + $0x8] sm:$0xff]  }
   0x8   :  { %v39_v19 = vsel %vm38_vm1, %v33_v7, %v11_v2  ;;  %v60_v20 = vsel %vm38_vm1, %v54_v8, %v11_v2  ;;  %v82_v21 = vsel %vm38_vm1, %v76_v9, %v11_v2  ;;  %v104_v22 = vsel %vm38_vm1, %v98_v10, %v11_v2  ;;  %v197_v32 = vld [vmem:[%s495_s3] sm:$0x1]  ;;  %s409_s7 = smov [#allocation12]  }
   0x9   :  { %v40_v24 = vpack.c.bf16 %v408_v23, %v39_v19  ;;  %v62_v25 = vpack.c.bf16 %v408_v23, %v60_v20  ;;  %v84_v26 = vpack.c.bf16 %v408_v23, %v82_v21  ;;  %v106_v27 = vpack.c.bf16 %v408_v23, %v104_v22  ;;  %s329_s8 = sshll.u32 %s409_s7, 4  ;;  %s330_s8 = int_to_ptr.vmem [resolvable:$true] %s329_s8 }
   0xa   :  { %v126_v28 = vsel %vm38_vm1, %v120_v14, %v11_v2  ;;  %v148_v29 = vsel %vm38_vm1, %v142_v15, %v11_v2  ;;  %v170_v30 = vsel %vm38_vm1, %v164_v16, %v11_v2  ;;  %v192_v31 = vsel %vm38_vm1, %v186_v17, %v11_v2  ;;  %s384_s0 = scalar_lea.vmem %s330_s8, 512  ;;  %p389_p1 = scmp.lt.s32.totalorder %s330_s8, %s330_s8 }
   0xb   :  { %42 = vst [vmem:[#allocation14] sm:$0xf] %v40_v24  ;;  %64 = vst [vmem:[#allocation14 + $0x4] sm:$0xf] %v62_v25  ;;  %v128_v33 = vpack.c.bf16 %v408_v23, %v126_v28  ;;  %v150_v34 = vpack.c.bf16 %v408_v23, %v148_v29  ;;  %v172_v35 = vpack.c.bf16 %v408_v23, %v170_v30  ;;  %vm201_vm2 = vcmp.lt.s32.totalorder %v199_v18, 1  ;;  %p385_p0 = scmp.ne.s32.totalorder %s330_s8, %s384_s0  ;;  %p390_p2 = scmp.lt.s32.totalorder %s384_s0, %s384_s0 }
   0xc   :  { %86 = vst [vmem:[#allocation14 + $0x8] sm:$0xf] %v84_v26  ;;  %108 = vst [vmem:[#allocation14 + $0xc] sm:$0xf] %v106_v27  ;;  %v194_v36 = vpack.c.bf16 %v408_v23, %v192_v31  ;;  %v202_v37 = vsel %vm201_vm2, %v197_v32, %v15_v1 }
   0xd   :  { %130 = vst [vmem:[#allocation14 + $0x10] sm:$0xf] %v128_v33  ;;  %152 = vst [vmem:[#allocation14 + $0x14] sm:$0xf] %v150_v34  ;;  %v207_v38 = vsel %vm38_vm1, %v202_v37, %v15_v1  ;;  %p391_p3 = por %p390_p2, %p389_p1 }
   0xe   :  { %174 = vst [vmem:[#allocation14 + $0x18] sm:$0xf] %v172_v35  ;;  %196 = vst [vmem:[#allocation14 + $0x1c] sm:$0xf] %v194_v36 }
   0xf   :  { %209 = vst [vmem:[#allocation15] sm:$0x1] %v207_v38  ;;  %p392_p4 = pnand %p391_p3, %p385_p0 }
  0x12   :  { %v378_v39 = vld [vmem:[#allocation14] sm:$0xff]  }
  0x13   :  { %v379_v40 = vld [vmem:[#allocation14 + $0x8] sm:$0xff]   ;;  %362 = vmatprep.subr.bf16.mxu0 %v378_v39 }
  0x14   :  { %363 = vmatpush3.bf16.msra.mxu0 %v378_v39  ;;  %v380_v41 = vld [vmem:[#allocation14 + $0x10] sm:$0xff]  }
  0x15   :  { %364 = vmatprep.subr.bf16.mxu0 %v379_v40  ;;  %v381_v42 = vld [vmem:[#allocation14 + $0x18] sm:$0xff]  }
  0x16   :  { %v347_v44 = vld [vmem:[#allocation15] ss:$0 sm:$0xff] }
  0x18   :  { %365 = vmatpush3.bf16.msra.mxu0 %v379_v40 }
  0x19   :  { %366 = vmatprep.subr.bf16.mxu0 %v380_v41 }
  0x1c   :  { %367 = vmatpush3.bf16.msra.mxu0 %v380_v41 }
  0x1d   :  { %368 = vmatprep.subr.bf16.mxu0 %v381_v42 }
  0x20   :  { %369 = vmatpush3.bf16.msra.mxu0 %v381_v42 }
  0x23   :  { %371 = vmatmul.mubr.msk.bf16.vlgmr.msra.gmra.mrb[0].mxu0 %vm264_vm0, %v383_v43 }
  0xf6   :  { %v372_v45 = vpop.f32.mrb[0].mxu0 }
  0xf7   :  { %v314_v46 = vadd.f32 %v372_v45, %v347_v44  ;;  %v305_v47 = vpop.f32.mrb[1].mxu0 }
  0xf8   :  { %v306_v48 = vadd.f32 %v347_v44, %v305_v47  ;;  %v373_v49 = vpop.f32.mrb[2].mxu0 }
  0xf9   :  { %322 = vst [vmem:[#allocation12 + $0x10] sm:$0xff] %v314_v46  ;;  %v317_v50 = vadd.f32 %v373_v49, %v347_v44  ;;  %v308_v51 = vpop.f32.mrb[3].mxu0 }
  0xfa   :  { %320 = vst [vmem:[#allocation12] sm:$0xff] %v306_v48  ;;  %v309_v52 = vadd.f32 %v347_v44, %v308_v51 }
  0xfb   :  { %323 = vst [vmem:[#allocation12 + $0x18] sm:$0xff] %v317_v50 }
  0xfc   :  { %321 = vst [vmem:[#allocation12 + $0x8] sm:$0xff] %v309_v52 }
  0xfd   :  { %395 = shalt.err (!%p392_p4)
}
  0xfe   :  { %s396_s11 = scalar_lea.hbm %s497_s5, 512 }
  0xff   :  { %p397_p5 = scmp.ne.s32.totalorder %s497_s5, %s396_s11  ;;  %p400_p6 = scmp.lt.u32.totalorder %s396_s11, %s497_s5 }
 0x101   :  { %p402_p7 = pnand %p400_p6, %p397_p5 }
 0x103   :  { %405 = shalt.err (!%p402_p7)
}
 0x104   :  { %s410_s16 = smov 128   ;;  %s411_s17 = smov 8  }
 0x105   :  { %335 = dma.vmem_to_hbm [thread:$0]  %s330_s8, 512, %s497_s5, [#allocation13], %s410_s16, %s410_s16, %s411_s17  }
 0x106   :  { %406 = dma.done.wait [#allocation13], 512  }
 0x107   :  { %407 = vsyncadd [#allocation13], 4294966784 }
 0x108   :  { %339 = vsyncpa [#allocation13], 1 }

</bundles_post_ra>
